<compile_context>
chip_gen: v7x
topology: tpu7x:2x2x1
jax: 0.10.0
libtpu: 0.0.40
codegen_flags: <defaults>
</compile_context>

<pallas_src>
import jax
import jax.numpy as jnp
from jax.experimental import pallas as pl
from jax.experimental.pallas import tpu as pltpu


def value_net_seq_kernel(
    x_ref,        # (Bp, D)      current timestep input
    h0_ref,       # (Bp, H)      initial hidden state
    c0_ref,       # (Bp, H)      initial cell state
    w1_ref,       # (D, H)
    b1_ref,       # (1, H)
    wlstm_ref,    # (2H, 4H)     [W_ih ; W_hh] stacked on the input axis
    blstm_ref,    # (1, 4H)      b_ih + b_hh
    w3_ref,       # (H, 1)
    b3_ref,       # (1, 1)
    v_ref,        # (Bp, 1)      per-step value output
    hy_ref,       # (Bp, H)      per-step hidden output
    cy_ref,       # (Bp, H)      per-step cell output
    h_scr,        # (Bp, H)      VMEM scratch: carried hidden state
    c_scr,        # (Bp, H)      VMEM scratch: carried cell state
):
    t = pl.program_id(0)

    # Load initial recurrent state into the carried scratch on the first step.
    @pl.when(t == 0)
    def _():
        h_scr[...] = h0_ref[...]
        c_scr[...] = c0_ref[...]

    x = x_ref[...]
    hx = h_scr[...]
    cx = c_scr[...]

    # l1: Linear(input_dim, n_hidden) + ReLU
    h1 = jnp.dot(x, w1_ref[...], preferred_element_type=jnp.float32) + b1_ref[...]
    h1 = jnp.maximum(h1, 0.0)

    # l2: LSTMCell — single fused matmul: [h1, hx] @ [W_ih; W_hh] + (b_ih+b_hh)
    hh = jnp.concatenate([h1, hx], axis=1)                      # (Bp, 2H)
    gates = (
        jnp.dot(hh, wlstm_ref[...], preferred_element_type=jnp.float32)
        + blstm_ref[...]
    )

    H = hy_ref.shape[-1]
    ingate = jax.nn.sigmoid(gates[:, 0 * H:1 * H])
    forgetgate = jax.nn.sigmoid(gates[:, 1 * H:2 * H])
    cellgate = jnp.tanh(gates[:, 2 * H:3 * H])
    outgate = jax.nn.sigmoid(gates[:, 3 * H:4 * H])

    cy = forgetgate * cx + ingate * cellgate
    hy = outgate * jnp.tanh(cy)

    # l3: Linear(n_hidden, 1)
    v = jnp.dot(hy, w3_ref[...], preferred_element_type=jnp.float32) + b3_ref[...]

    v_ref[...] = v
    hy_ref[...] = hy
    cy_ref[...] = cy
    # Carry state to the next grid step.
    h_scr[...] = hy
    c_scr[...] = cy


def value_network_forward_sequence(xs, hx, cx, params):
    """Runs T ValueNetwork steps (shared weights, carried LSTM state) in one
    pallas_call.

    xs: (T, B, D), hx/cx: (B, H).
    params uses PyTorch-convention shapes:
      l1.weight (H, D), l1.bias (H,)
      l2.weight_ih (4H, H), l2.weight_hh (4H, H), l2.bias_ih (4H,), l2.bias_hh (4H,)
      l3.weight (1, H), l3.bias (1,)
    Returns (vs (T,B,1), (hys (T,B,H), cys (T,B,H))).
    """
    T, B, D = xs.shape
    H = hx.shape[1]

    # Pad batch to a multiple of 8 sublanes.
    Bp = ((B + 7) // 8) * 8
    if Bp != B:
        xs_p = jnp.pad(xs, ((0, 0), (0, Bp - B), (0, 0)))
        hx_p = jnp.pad(hx, ((0, Bp - B), (0, 0)))
        cx_p = jnp.pad(cx, ((0, Bp - B), (0, 0)))
    else:
        xs_p, hx_p, cx_p = xs, hx, cx

    # Weight prep: (in, out) layout, fused LSTM weight/bias.
    w1 = params["l1.weight"].T                                       # (D, H)
    b1 = params["l1.bias"].reshape(1, H)
    w_lstm = jnp.concatenate(
        [params["l2.weight_ih"].T, params["l2.weight_hh"].T], axis=0)  # (2H, 4H)
    b_lstm = (params["l2.bias_ih"] + params["l2.bias_hh"]).reshape(1, 4 * H)
    w3 = params["l3.weight"].T                                       # (H, 1)
    b3 = params["l3.bias"].reshape(1, 1)

    resident = lambda shape: pl.BlockSpec(shape, lambda t: (0,) * len(shape))

    grid_spec = pltpu.PrefetchScalarGridSpec(
        num_scalar_prefetch=0,
        grid=(T,),
        in_specs=[
            pl.BlockSpec((None, Bp, D), lambda t: (t, 0, 0)),   # xs (per-step)
            resident((Bp, H)),                                  # hx0
            resident((Bp, H)),                                  # cx0
            resident((D, H)),                                   # w1
            resident((1, H)),                                   # b1
            resident((2 * H, 4 * H)),                           # w_lstm
            resident((1, 4 * H)),                               # b_lstm
            resident((H, 1)),                                   # w3
            resident((1, 1)),                                   # b3
        ],
        out_specs=[
            pl.BlockSpec((None, Bp, 1), lambda t: (t, 0, 0)),   # vs
            pl.BlockSpec((None, Bp, H), lambda t: (t, 0, 0)),   # hys
            pl.BlockSpec((None, Bp, H), lambda t: (t, 0, 0)),   # cys
        ],
        scratch_shapes=[
            pltpu.VMEM((Bp, H), jnp.float32),                   # carried h
            pltpu.VMEM((Bp, H), jnp.float32),                   # carried c
        ],
    )

    out_shapes = (
        jax.ShapeDtypeStruct((T, Bp, 1), jnp.float32),
        jax.ShapeDtypeStruct((T, Bp, H), jnp.float32),
        jax.ShapeDtypeStruct((T, Bp, H), jnp.float32),
    )

    vs, hys, cys = pl.pallas_call(
        value_net_seq_kernel,
        out_shape=out_shapes,
        grid_spec=grid_spec,
        compiler_params=pltpu.CompilerParams(
            dimension_semantics=("arbitrary",)),   # time recurrence: sequential
    )(xs_p, hx_p, cx_p, w1, b1, w_lstm, b_lstm, w3, b3)

    return vs[:, :B], (hys[:, :B], cys[:, :B])


def value_network_forward(x, hx, cx, params):
    """Single-step forward matching the PyTorch module exactly (T=1 case)."""
    vs, (hys, cys) = value_network_forward_sequence(x[None], hx, cx, params)
    return vs[0], (hys[0], cys[0])


def init_params(key, input_dim, n_hidden):
    """Deterministic synthetic init (stand-in for weight_init)."""
    ks = jax.random.split(key, 8)
    scale = 0.1
    return {
        "l1.weight": scale * jax.random.normal(ks[0], (n_hidden, input_dim), jnp.float32),
        "l1.bias": scale * jax.random.normal(ks[1], (n_hidden,), jnp.float32),
        "l2.weight_ih": scale * jax.random.normal(ks[2], (4 * n_hidden, n_hidden), jnp.float32),
        "l2.weight_hh": scale * jax.random.normal(ks[3], (4 * n_hidden, n_hidden), jnp.float32),
        "l2.bias_ih": scale * jax.random.normal(ks[4], (4 * n_hidden,), jnp.float32),
        "l2.bias_hh": scale * jax.random.normal(ks[5], (4 * n_hidden,), jnp.float32),
        "l3.weight": scale * jax.random.normal(ks[6], (1, n_hidden), jnp.float32),
        "l3.bias": scale * jax.random.normal(ks[7], (1,), jnp.float32),
    }


def reference_step(x, hx, cx, p):
    """Pure-JAX reference mirroring the PyTorch forward exactly."""
    h1 = jnp.maximum(x @ p["l1.weight"].T + p["l1.bias"], 0.0)
    gates = (h1 @ p["l2.weight_ih"].T + hx @ p["l2.weight_hh"].T
             + p["l2.bias_ih"] + p["l2.bias_hh"])
    H = hx.shape[1]
    i, f, g, o = (gates[:, k * H:(k + 1) * H] for k in range(4))
    i = jax.nn.sigmoid(i)
    f = jax.nn.sigmoid(f)
    g = jnp.tanh(g)
    o = jax.nn.sigmoid(o)
    cy = f * cx + i * g
    hy = o * jnp.tanh(cy)
    v = hy @ p["l3.weight"].T + p["l3.bias"]
    return v, (hy, cy)


def reference_sequence(xs, hx, cx, p):
    def step(carry, x):
        h, c = carry
        v, (hy, cy) = reference_step(x, h, c, p)
        return (hy, cy), (v, hy, cy)
    _, (vs, hys, cys) = jax.lax.scan(step, (hx, cx), xs)
    return vs, hys, cys


if __name__ == "__main__":
    T, B, D, H = 8, 2, 16, 32

    key = jax.random.PRNGKey(0)
    kx, kh, kc, kp = jax.random.split(key, 4)
    xs = jax.random.normal(kx, (T, B, D), jnp.float32)
    hx = jax.random.normal(kh, (B, H), jnp.float32)
    cx = jax.random.normal(kc, (B, H), jnp.float32)
    params = init_params(kp, D, H)

    # Full-sequence kernel (T steps, one pallas_call).
    vs, (hys, cys) = value_network_forward_sequence(xs, hx, cx, params)
    jax.block_until_ready((vs, hys, cys))

    vs_ref, hys_ref, cys_ref = reference_sequence(xs, hx, cx, params)
    assert jnp.allclose(vs, vs_ref, atol=1e-4, rtol=1e-4), "sequence value mismatch"
    assert jnp.allclose(hys, hys_ref, atol=1e-4, rtol=1e-4), "sequence hy mismatch"
    assert jnp.allclose(cys, cys_ref, atol=1e-4, rtol=1e-4), "sequence cy mismatch"

    # Single-step entry point (matches the PyTorch module forward).
    v1, (hy1, cy1) = value_network_forward(xs[0], hx, cx, params)
    jax.block_until_ready((v1, hy1, cy1))
    v1_ref, (hy1_ref, cy1_ref) = reference_step(xs[0], hx, cx, params)
    assert jnp.allclose(v1, v1_ref, atol=1e-4, rtol=1e-4), "step value mismatch"
    assert jnp.allclose(hy1, hy1_ref, atol=1e-4, rtol=1e-4), "step hy mismatch"
    assert jnp.allclose(cy1, cy1_ref, atol=1e-4, rtol=1e-4), "step cy mismatch"

    print("KERNEL_OK")
</pallas_src>

<mosaic_0001>
module attributes {stable_mosaic.version = 11 : i64} {
  func.func @value_net_seq_kernel(%arg0: i32, %arg1: memref<1x8x16xf32, #tpu.memory_space<vmem>>, %arg2: memref<8x32xf32, #tpu.memory_space<vmem>>, %arg3: memref<8x32xf32, #tpu.memory_space<vmem>>, %arg4: memref<16x32xf32, #tpu.memory_space<vmem>>, %arg5: memref<1x32xf32, #tpu.memory_space<vmem>>, %arg6: memref<64x128xf32, #tpu.memory_space<vmem>>, %arg7: memref<1x128xf32, #tpu.memory_space<vmem>>, %arg8: memref<32x1xf32, #tpu.memory_space<vmem>>, %arg9: memref<1x1xf32, #tpu.memory_space<vmem>>, %arg10: memref<1x8x1xf32, #tpu.memory_space<vmem>>, %arg11: memref<1x8x32xf32, #tpu.memory_space<vmem>>, %arg12: memref<1x8x32xf32, #tpu.memory_space<vmem>>, %arg13: memref<8x32xf32, #tpu.memory_space<vmem>>, %arg14: memref<8x32xf32, #tpu.memory_space<vmem>>) attributes {dimension_semantics = [#tpu.dimension_semantics<arbitrary>], iteration_bounds = array<i64: 8>, scalar_prefetch = 0 : i64, scratch_operands = 2 : i64, tpu.core_type = #tpu.core_type<tc>, window_params = [{transform_indices = @transform_0, window_bounds = array<i64: 1, 8, 16>}, {pipeline_mode = #tpu.pipeline_mode<synchronous>, transform_indices = @transform_1, window_bounds = array<i64: 8, 32>}, {pipeline_mode = #tpu.pipeline_mode<synchronous>, transform_indices = @transform_2, window_bounds = array<i64: 8, 32>}, {pipeline_mode = #tpu.pipeline_mode<synchronous>, transform_indices = @transform_3, window_bounds = array<i64: 16, 32>}, {pipeline_mode = #tpu.pipeline_mode<synchronous>, transform_indices = @transform_4, window_bounds = array<i64: 1, 32>}, {pipeline_mode = #tpu.pipeline_mode<synchronous>, transform_indices = @transform_5, window_bounds = array<i64: 64, 128>}, {pipeline_mode = #tpu.pipeline_mode<synchronous>, transform_indices = @transform_6, window_bounds = array<i64: 1, 128>}, {pipeline_mode = #tpu.pipeline_mode<synchronous>, transform_indices = @transform_7, window_bounds = array<i64: 32, 1>}, {pipeline_mode = #tpu.pipeline_mode<synchronous>, transform_indices = @transform_8, window_bounds = array<i64: 1, 1>}, {transform_indices = @transform_9, window_bounds = array<i64: 1, 8, 1>}, {transform_indices = @transform_10, window_bounds = array<i64: 1, 8, 32>}, {transform_indices = @transform_11, window_bounds = array<i64: 1, 8, 32>}]} {
    %c0_i32 = arith.constant 0 : i32
    %0 = arith.cmpi eq, %arg0, %c0_i32 : i32
    %1 = arith.extui %0 : i1 to i32
    %c0_i32_0 = arith.constant 0 : i32
    %2 = arith.cmpi ne, %1, %c0_i32_0 : i32
    scf.if %2 {
      %c0_38 = arith.constant 0 : index
      %c0_39 = arith.constant 0 : index
      %61 = vector.load %arg2[%c0_38, %c0_39] : memref<8x32xf32, #tpu.memory_space<vmem>>, vector<8x32xf32>
      %c0_40 = arith.constant 0 : index
      %c0_41 = arith.constant 0 : index
      %62 = vector.load %arg13[%c0_40, %c0_41] : memref<8x32xf32, #tpu.memory_space<vmem>>, vector<8x32xf32>
      tpu.vector_store %arg13[%c0_40, %c0_41], %61 {strides = array<i32>} : memref<8x32xf32, #tpu.memory_space<vmem>>, vector<8x32xf32>,
      %c0_42 = arith.constant 0 : index
      %c0_43 = arith.constant 0 : index
      %63 = vector.load %arg3[%c0_42, %c0_43] : memref<8x32xf32, #tpu.memory_space<vmem>>, vector<8x32xf32>
      %c0_44 = arith.constant 0 : index
      %c0_45 = arith.constant 0 : index
      %64 = vector.load %arg14[%c0_44, %c0_45] : memref<8x32xf32, #tpu.memory_space<vmem>>, vector<8x32xf32>
      tpu.vector_store %arg14[%c0_44, %c0_45], %63 {strides = array<i32>} : memref<8x32xf32, #tpu.memory_space<vmem>>, vector<8x32xf32>,
    } else {
    }
    %c0 = arith.constant 0 : index
    %c0_1 = arith.constant 0 : index
    %c0_2 = arith.constant 0 : index
    %3 = vector.load %arg1[%c0, %c0_1, %c0_2] : memref<1x8x16xf32, #tpu.memory_space<vmem>>, vector<1x8x16xf32>
    %4 = vector.shape_cast %3 : vector<1x8x16xf32> to vector<8x16xf32>
    %c0_3 = arith.constant 0 : index
    %c0_4 = arith.constant 0 : index
    %5 = vector.load %arg13[%c0_3, %c0_4] : memref<8x32xf32, #tpu.memory_space<vmem>>, vector<8x32xf32>
    %c0_5 = arith.constant 0 : index
    %c0_6 = arith.constant 0 : index
    %6 = vector.load %arg14[%c0_5, %c0_6] : memref<8x32xf32, #tpu.memory_space<vmem>>, vector<8x32xf32>
    %c0_7 = arith.constant 0 : index
    %c0_8 = arith.constant 0 : index
    %7 = vector.load %arg4[%c0_7, %c0_8] : memref<16x32xf32, #tpu.memory_space<vmem>>, vector<16x32xf32>
    %cst = arith.constant dense<0.000000e+00> : vector<8x32xf32>
    %8 = tpu.matmul %4, %7, %cst {dimension_numbers = #tpu.dot_dimension_numbers<[1], [0], [0], [1], [0, 0, 1, 1], [], []>} : vector<8x16xf32>, vector<16x32xf32>, vector<8x32xf32> -> vector<8x32xf32>
    %c0_9 = arith.constant 0 : index
    %c0_10 = arith.constant 0 : index
    %9 = vector.load %arg5[%c0_9, %c0_10] : memref<1x32xf32, #tpu.memory_space<vmem>>, vector<1x32xf32>
    %10 = vector.broadcast %9 : vector<1x32xf32> to vector<8x32xf32>
    %11 = arith.addf %8, %10 : vector<8x32xf32>
    %cst_11 = arith.constant 0.000000e+00 : f32
    %12 = vector.broadcast %cst_11 : f32 to vector<8x32xf32>
    %13 = arith.maximumf %11, %12 : vector<8x32xf32>
    %14 = tpu.concatenate %13, %5 in 1 : vector<8x32xf32>, vector<8x32xf32> -> vector<8x64xf32>
    %c0_12 = arith.constant 0 : index
    %c0_13 = arith.constant 0 : index
    %15 = vector.load %arg6[%c0_12, %c0_13] : memref<64x128xf32, #tpu.memory_space<vmem>>, vector<64x128xf32>
    %cst_14 = arith.constant dense<0.000000e+00> : vector<8x128xf32>
    %16 = tpu.matmul %14, %15, %cst_14 {dimension_numbers = #tpu.dot_dimension_numbers<[1], [0], [0], [1], [0, 0, 1, 1], [], []>} : vector<8x64xf32>, vector<64x128xf32>, vector<8x128xf32> -> vector<8x128xf32>
    %c0_15 = arith.constant 0 : index
    %c0_16 = arith.constant 0 : index
    %17 = vector.load %arg7[%c0_15, %c0_16] : memref<1x128xf32, #tpu.memory_space<vmem>>, vector<1x128xf32>
    %18 = vector.broadcast %17 : vector<1x128xf32> to vector<8x128xf32>
    %19 = arith.addf %16, %18 : vector<8x128xf32>
    %20 = vector.extract_strided_slice %19 {offsets = [0, 0], sizes = [8, 32], strides = [1, 1]} : vector<8x128xf32> to vector<8x32xf32>
    %21 = arith.negf %20 : vector<8x32xf32>
    %22 = math.exp %21 : vector<8x32xf32>
    %cst_17 = arith.constant 1.000000e+00 : f32
    %23 = vector.broadcast %cst_17 : f32 to vector<8x32xf32>
    %24 = arith.addf %23, %22 : vector<8x32xf32>
    %25 = arith.divf %23, %24 : vector<8x32xf32>
    %26 = vector.extract_strided_slice %19 {offsets = [0, 32], sizes = [8, 32], strides = [1, 1]} : vector<8x128xf32> to vector<8x32xf32>
    %27 = arith.negf %26 : vector<8x32xf32>
    %28 = math.exp %27 : vector<8x32xf32>
    %cst_18 = arith.constant 1.000000e+00 : f32
    %29 = vector.broadcast %cst_18 : f32 to vector<8x32xf32>
    %30 = arith.addf %29, %28 : vector<8x32xf32>
    %31 = arith.divf %29, %30 : vector<8x32xf32>
    %32 = vector.extract_strided_slice %19 {offsets = [0, 64], sizes = [8, 32], strides = [1, 1]} : vector<8x128xf32> to vector<8x32xf32>
    %33 = math.tanh %32 : vector<8x32xf32>
    %34 = vector.extract_strided_slice %19 {offsets = [0, 96], sizes = [8, 32], strides = [1, 1]} : vector<8x128xf32> to vector<8x32xf32>
    %35 = arith.negf %34 : vector<8x32xf32>
    %36 = math.exp %35 : vector<8x32xf32>
    %cst_19 = arith.constant 1.000000e+00 : f32
    %37 = vector.broadcast %cst_19 : f32 to vector<8x32xf32>
    %38 = arith.addf %37, %36 : vector<8x32xf32>
    %39 = arith.divf %37, %38 : vector<8x32xf32>
    %40 = arith.mulf %31, %6 : vector<8x32xf32>
    %41 = arith.mulf %25, %33 : vector<8x32xf32>
    %42 = arith.addf %40, %41 : vector<8x32xf32>
    %43 = math.tanh %42 : vector<8x32xf32>
    %44 = arith.mulf %39, %43 : vector<8x32xf32>
    %c0_20 = arith.constant 0 : index
    %c0_21 = arith.constant 0 : index
    %45 = vector.load %arg8[%c0_20, %c0_21] : memref<32x1xf32, #tpu.memory_space<vmem>>, vector<32x1xf32>
    %cst_22 = arith.constant dense<0.000000e+00> : vector<8x1xf32>
    %46 = tpu.matmul %44, %45, %cst_22 {dimension_numbers = #tpu.dot_dimension_numbers<[1], [0], [0], [1], [0, 0, 1, 1], [], []>} : vector<8x32xf32>, vector<32x1xf32>, vector<8x1xf32> -> vector<8x1xf32>
    %c0_23 = arith.constant 0 : index
    %c0_24 = arith.constant 0 : index
    %47 = vector.load %arg9[%c0_23, %c0_24] : memref<1x1xf32, #tpu.memory_space<vmem>>, vector<1x1xf32>
    %48 = vector.broadcast %47 : vector<1x1xf32> to vector<8x1xf32>
    %49 = arith.addf %46, %48 : vector<8x1xf32>
    %c0_25 = arith.constant 0 : index
    %c0_26 = arith.constant 0 : index
    %c0_27 = arith.constant 0 : index
    %50 = vector.load %arg10[%c0_25, %c0_26, %c0_27] : memref<1x8x1xf32, #tpu.memory_space<vmem>>, vector<1x8x1xf32>
    %51 = vector.shape_cast %50 : vector<1x8x1xf32> to vector<8x1xf32>
    %52 = vector.shape_cast %49 : vector<8x1xf32> to vector<1x8x1xf32>
    tpu.vector_store %arg10[%c0_25, %c0_26, %c0_27], %52 {strides = array<i32>} : memref<1x8x1xf32, #tpu.memory_space<vmem>>, vector<1x8x1xf32>,
    %c0_28 = arith.constant 0 : index
    %c0_29 = arith.constant 0 : index
    %c0_30 = arith.constant 0 : index
    %53 = vector.load %arg11[%c0_28, %c0_29, %c0_30] : memref<1x8x32xf32, #tpu.memory_space<vmem>>, vector<1x8x32xf32>
    %54 = vector.shape_cast %53 : vector<1x8x32xf32> to vector<8x32xf32>
    %55 = vector.shape_cast %44 : vector<8x32xf32> to vector<1x8x32xf32>
    tpu.vector_store %arg11[%c0_28, %c0_29, %c0_30], %55 {strides = array<i32>} : memref<1x8x32xf32, #tpu.memory_space<vmem>>, vector<1x8x32xf32>,
    %c0_31 = arith.constant 0 : index
    %c0_32 = arith.constant 0 : index
    %c0_33 = arith.constant 0 : index
    %56 = vector.load %arg12[%c0_31, %c0_32, %c0_33] : memref<1x8x32xf32, #tpu.memory_space<vmem>>, vector<1x8x32xf32>
    %57 = vector.shape_cast %56 : vector<1x8x32xf32> to vector<8x32xf32>
    %58 = vector.shape_cast %42 : vector<8x32xf32> to vector<1x8x32xf32>
    tpu.vector_store %arg12[%c0_31, %c0_32, %c0_33], %58 {strides = array<i32>} : memref<1x8x32xf32, #tpu.memory_space<vmem>>, vector<1x8x32xf32>,
    %c0_34 = arith.constant 0 : index
    %c0_35 = arith.constant 0 : index
    %59 = vector.load %arg13[%c0_34, %c0_35] : memref<8x32xf32, #tpu.memory_space<vmem>>, vector<8x32xf32>
    tpu.vector_store %arg13[%c0_34, %c0_35], %44 {strides = array<i32>} : memref<8x32xf32, #tpu.memory_space<vmem>>, vector<8x32xf32>,
    %c0_36 = arith.constant 0 : index
    %c0_37 = arith.constant 0 : index
    %60 = vector.load %arg14[%c0_36, %c0_37] : memref<8x32xf32, #tpu.memory_space<vmem>>, vector<8x32xf32>
    tpu.vector_store %arg14[%c0_36, %c0_37], %42 {strides = array<i32>} : memref<8x32xf32, #tpu.memory_space<vmem>>, vector<8x32xf32>,
    return
  }
  func.func @transform_0(%arg0: i32) -> (i32, i32, i32) {
    %c0_i32 = arith.constant 0 : i32
    %c0_i32_0 = arith.constant 0 : i32
    %c0_i32_1 = arith.constant 0 : i32
    return %arg0, %c0_i32, %c0_i32_0 : i32, i32, i32
  }
  func.func @transform_1(%arg0: i32) -> (i32, i32) {
    %c0_i32 = arith.constant 0 : i32
    %c0_i32_0 = arith.constant 0 : i32
    %c0_i32_1 = arith.constant 0 : i32
    return %c0_i32, %c0_i32_0 : i32, i32
  }
  func.func @transform_2(%arg0: i32) -> (i32, i32) {
    %c0_i32 = arith.constant 0 : i32
    %c0_i32_0 = arith.constant 0 : i32
    %c0_i32_1 = arith.constant 0 : i32
    return %c0_i32, %c0_i32_0 : i32, i32
  }
  func.func @transform_3(%arg0: i32) -> (i32, i32) {
    %c0_i32 = arith.constant 0 : i32
    %c0_i32_0 = arith.constant 0 : i32
    %c0_i32_1 = arith.constant 0 : i32
    return %c0_i32, %c0_i32_0 : i32, i32
  }
  func.func @transform_4(%arg0: i32) -> (i32, i32) {
    %c0_i32 = arith.constant 0 : i32
    %c0_i32_0 = arith.constant 0 : i32
    %c0_i32_1 = arith.constant 0 : i32
    return %c0_i32, %c0_i32_0 : i32, i32
  }
  func.func @transform_5(%arg0: i32) -> (i32, i32) {
    %c0_i32 = arith.constant 0 : i32
    %c0_i32_0 = arith.constant 0 : i32
    %c0_i32_1 = arith.constant 0 : i32
    return %c0_i32, %c0_i32_0 : i32, i32
  }
  func.func @transform_6(%arg0: i32) -> (i32, i32) {
    %c0_i32 = arith.constant 0 : i32
    %c0_i32_0 = arith.constant 0 : i32
    %c0_i32_1 = arith.constant 0 : i32
    return %c0_i32, %c0_i32_0 : i32, i32
  }
  func.func @transform_7(%arg0: i32) -> (i32, i32) {
    %c0_i32 = arith.constant 0 : i32
    %c0_i32_0 = arith.constant 0 : i32
    %c0_i32_1 = arith.constant 0 : i32
    return %c0_i32, %c0_i32_0 : i32, i32
  }
  func.func @transform_8(%arg0: i32) -> (i32, i32) {
    %c0_i32 = arith.constant 0 : i32
    %c0_i32_0 = arith.constant 0 : i32
    %c0_i32_1 = arith.constant 0 : i32
    return %c0_i32, %c0_i32_0 : i32, i32
  }
  func.func @transform_9(%arg0: i32) -> (i32, i32, i32) {
    %c0_i32 = arith.constant 0 : i32
    %c0_i32_0 = arith.constant 0 : i32
    %c0_i32_1 = arith.constant 0 : i32
    return %arg0, %c0_i32, %c0_i32_0 : i32, i32, i32
  }
  func.func @transform_10(%arg0: i32) -> (i32, i32, i32) {
    %c0_i32 = arith.constant 0 : i32
    %c0_i32_0 = arith.constant 0 : i32
    %c0_i32_1 = arith.constant 0 : i32
    return %arg0, %c0_i32, %c0_i32_0 : i32, i32, i32
  }
  func.func @transform_11(%arg0: i32) -> (i32, i32, i32) {
    %c0_i32 = arith.constant 0 : i32
    %c0_i32_0 = arith.constant 0 : i32
    %c0_i32_1 = arith.constant 0 : i32
    return %arg0, %c0_i32, %c0_i32_0 : i32, i32, i32
  }
}

</mosaic_0001>

<bundles_post_ra>
// kernel: tpu_custom_call.1
= control target key start
LH: loop header
LB: loop body
LE: loop exit
PB: predicated region body
PF: predicated region fallthrough
CT: control target
= control target key end

     0   :  { %s1631_s0 = inlined_call_operand.hbm [shape: f32[8,8,16], index: 0, kind: input, shape index: {}]   ;;  %s1632_s1 = inlined_call_operand.vmem [shape: f32[8,32], index: 1, kind: input, shape index: {}]   ;;  %s1633_s2 = inlined_call_operand.vmem [shape: f32[8,32], index: 2, kind: input, shape index: {}]   ;;  %s1634_s3 = inlined_call_operand.vmem [shape: f32[16,32], index: 3, kind: input, shape index: {}]   ;;  %s1635_s4 = inlined_call_operand.vmem [shape: f32[1,32], index: 4, kind: input, shape index: {}]   ;;  %s1636_s5 = inlined_call_operand.hbm [shape: f32[64,128], index: 5, kind: input, shape index: {}]   ;;  %s1637_s6 = inlined_call_operand.vmem [shape: f32[1,128], index: 6, kind: input, shape index: {}]   ;;  %s1638_s7 = inlined_call_operand.vmem [shape: f32[32,1], index: 7, kind: input, shape index: {}]   ;;  %s1639_s8 = inlined_call_operand.<no memory space> [shape: f32[1,1], index: 8, kind: input, shape index: {}]   ;;  %s1640_s9 = inlined_call_operand.vmem [shape: f32[8,8,1], index: 9, kind: output, shape index: {0}]   ;;  %s1641_s10 = inlined_call_operand.hbm [shape: f32[8,8,32], index: 10, kind: output, shape index: {1}]   ;;  %s1642_s11 = inlined_call_operand.hbm [shape: f32[8,8,32], index: 11, kind: output, shape index: {2}]  }
   0x1   :  { %1652 = sst [smem:[#allocation20_spill]] %s1631_s0  ;;  %v17_v0 = vstv %s1639_s8 }
   0x2   :  { %1653 = sst [smem:[#allocation21_spill]] %s1632_s1  ;;  %18 = vst [vmem:[#allocation4] sm:$0x1] %v17_v0 }
   0x3   :  { %1654 = sst [smem:[#allocation22_spill]] %s1633_s2 }
   0x4   :  { %19 = vsyncpa [#allocation6], 0 }
   0x5   :  { %21 = vsyncpa [#allocation6 + $0x1], 0 }
   0x6   :  { %22 = vsyncpa [#allocation9], 0 }
   0x7   :  { %23 = vsyncpa [#allocation7], 0 }
   0x8   :  { %25 = vsyncpa [#allocation7 + $0x1], 0 }
   0x9   :  { %26 = vsyncpa [#allocation12], 0 }
   0xa   :  { %28 = vsyncpa [#allocation12 + $0x1], 0  ;;  %s1347_s19 = smov 0   ;;  %s1349_s20 = smov 0  }
   0xb   :  { %s1351_s21 = smov 0   ;;  %s1353_s22 = smov 0  }
   0xc LB: > { %1655 = sst [smem:[#allocation17_spill]] %s1258_s19  ;;  %s1368_s8 = sadd.s32 4294967295, %s1270_s22   ;;  %s1270_s22 = sphi %s1353_s22, %s1680_s22   ;;  %s1266_s21 = sphi %s1351_s21, %s1683_s21   ;;  %s1262_s20 = sphi %s1349_s20, %s1682_s20   ;;  %s1258_s19 = sphi %s1347_s19, %s1681_s19  }
   0xd   : > { %s931_s23 = sadd.s32 4294967294, %s1270_s22   ;;  %p54_p0 = scmp.ne.s32.totalorder %s1262_s20, %s1258_s19 }
   0xe   : > { %p1644_p1 = scmp.eq.s32.totalorder %s1368_s8, 0  ;;  %p278_p3 = scmp.eq.s32.totalorder %s931_s23, 7 }
   0xf   : > { %p932_p5 = scmp.ge.s32.totalorder %s1270_s22, 1  ;;  %p311_p7 = scmp.lt.s32.totalorder %s1270_s22, 9 }
  0x10   : > { %p1377_p4 = por %p1644_p1, %p54_p0  ;;  %p1382_p6 = por %p278_p3, %p54_p0 }
  0x11   : > { %p1388_p9 = pnand %p932_p5, %p311_p7  ;;  %s1272_s27 = smov [#allocation8]  }
  0x12   : > { %s1656_s24 = scalar_select %p1377_p4, 1, 0 }
  0x13   : > { %s1657_s25 = scalar_select %p1382_p6, 1, 0 }
  0x14   : > { %s1659_s26 = scalar_select %p1388_p9, 1, 0 }
  0x15   : > { %1658 = sst [smem:[#allocation18_spill]] %s1657_s25  ;;  %s335_s28 = sshll.u32 %s1272_s27, 4  ;;  %s336_s28 = int_to_ptr.vmem [resolvable:$true] %s335_s28 }
  0x16   : > { %p1042_p10 = pneg %p1388_p9  ;;  %s1401_s30 = sadd.s32 1, %s1270_s22  }
  0x17   : > { %1661 = sst [smem:[#allocation19_spill]] %s1401_s30  ;;  %s41_s12 = sadd.s32 1, %s1266_s21 }
  0x18   : > { %p1396_p11 = pnand %p1042_p10, %p1644_p1  ;;  %s38_s13 = ssub.s32 %s1270_s22, %s1401_s30 }
  0x19   : > { %s1110_s16 = scalar_lea.hbm %s1636_s5, 1024 }
  0x1a   : > { %p1111_p12 = scmp.ne.s32.totalorder %s1636_s5, %s1110_s16  ;;  %p1112_p13 = pneg %p1396_p11 }
  0x1b   : > { %p1117_p5 = scmp.lt.u32.totalorder %s1110_s16, %s1636_s5 }
  0x1c   : > { %p1113_p0 = pnand %p1112_p13, %p1111_p12 }
  0x1e   : > { %p1114_p3 = pneg %p1113_p0 }
  0x20   : > { %p1119_p7 = pnand %p1117_p5, %p1114_p3 }
  0x22   : > { %1122 = shalt.err (!%p1119_p7)
}
  0x23   : > { %s1123_s25 = scalar_lea.vmem %s336_s28, 1024  ;;  %p1131_p2 = scmp.lt.s32.totalorder %s336_s28, %s336_s28 }
  0x24   : > { %p1124_p10 = scmp.ne.s32.totalorder %s336_s28, %s1123_s25  ;;  %p1132_p6 = scmp.lt.s32.totalorder %s1123_s25, %s1123_s25 }
  0x26   : > { %p1126_p8 = pnand %p1124_p10, %p1112_p13  ;;  %p1133_p4 = por %p1132_p6, %p1131_p2 }
  0x28   : > { %p1127_p1 = pneg %p1126_p8 }
  0x2a   : > { %p1134_p9 = pnand %p1133_p4, %p1127_p1 }
  0x2c   : > { %1137 = shalt.err (!%p1134_p9)
}
  0x2d   : > { %s1273_s14 = smov 128   ;;  %s1274_s15 = smov 8  }
  0x2e   : > { %1045 = dma.hbm_to_vmem [thread:$0]  (!%p1396_p11), %s1636_s5, 1024, %s336_s28, [#allocation9], %s1273_s14, %s1273_s14, %s1274_s15  }
  0x2f   : > { %p39_p8 = scmp.eq.s32.totalorder %s38_s13, 0  ;;  %p48_p2 = scmp.ne.s32.totalorder %s1266_s21, %s1262_s20 }
  0x30   : > { %p49_p1 = scmp.eq.s32.totalorder %s1270_s22, 0  ;;  %p1058_p4 = scmp.lt.s32.totalorder %s1270_s22, 8 }
  0x31   : > { %s1427_s25 = scalar_select %p39_p8, %s1266_s21, %s41_s12  }
  0x32   : > { %p50_p6 = por %p49_p1, %p48_p2  ;;  %p1662_p9 = scmp.eq.s32.totalorder %s1368_s8, 7 }
  0x33   : > { %s358_s23 = sand.u32 1, %s1266_s21   ;;  %s936_s27 = sshll.u32 %s1270_s22, 7 }
  0x34   : > { %p1431_p12 = por %p1662_p9, %p48_p2  ;;  %s935_s30 = sshll.u32 %s358_s23, 3 }
  0x35   : > { %s1664_s0 = sld [smem:[#allocation20_spill]]  ;;  %s362_s28 = scalar_lea.vmem [#allocation5], %s935_s30 }
  0x36   : > { %s369_s12 = sshll.u32 %s362_s28, 4  ;;  %p1442_p11 = pnand %p1058_p4, %p50_p6  ;;  %s1446_s12 = int_to_ptr.vmem [resolvable:$true] %s369_s12 }
  0x37   : > { %s359_s14 = scalar_lea.sflag [#allocation6], %s358_s23 }
  0x38   : > { %p1140_p0 = pneg %p1442_p11 }
  0x3b   : > { %s1440_s16 = scalar_lea.hbm %s1664_s0, %s936_s27  ;;  %s1143_s17 = scalar_lea.hbm %s1664_s0, 1024 }
  0x3c   : > { %s1138_s15 = scalar_lea.hbm %s1440_s16, 128  ;;  %p1144_p7 = scmp.lt.u32.totalorder %s1440_s16, %s1664_s0 }
  0x3d   : > { %p1139_p13 = scmp.ne.s32.totalorder %s1440_s16, %s1138_s15  ;;  %p1145_p10 = scmp.lt.u32.totalorder %s1143_s17, %s1138_s15 }
  0x3e   : > { %p1147_p2 = scmp.lt.u32.totalorder %s1138_s15, %s1440_s16 }
  0x3f   : > { %p1141_p3 = pnand %p1140_p0, %p1139_p13  ;;  %p1146_p8 = por %p1145_p10, %p1144_p7 }
  0x41   : > { %p1142_p5 = pneg %p1141_p3  ;;  %p1148_p1 = por %p1147_p2, %p1146_p8 }
  0x43   : > { %p1149_p4 = pnand %p1148_p1, %p1142_p5 }
  0x45   : > { %1152 = shalt.err (!%p1149_p4)
}
  0x46   : > { %s1153_s23 = scalar_lea.vmem %s1446_s12, 128  ;;  %s1275_s28 = smov [#allocation5]  }
  0x47   : > { %p1154_p6 = scmp.ne.s32.totalorder %s1446_s12, %s1153_s23  ;;  %s1158_s19 = sshll.u32 %s1275_s28, 4  ;;  %s1159_s19 = int_to_ptr.vmem [resolvable:$false] %s1158_s19 }
  0x48   : > { %s1160_s30 = scalar_lea.vmem %s1159_s19, 256  ;;  %p1161_p3 = scmp.lt.s32.totalorder %s1446_s12, %s1159_s19 }
  0x49   : > { %p1156_p9 = pnand %p1154_p6, %p1140_p0  ;;  %p1162_p7 = scmp.lt.s32.totalorder %s1160_s30, %s1153_s23 }
  0x4b   : > { %p1157_p13 = pneg %p1156_p9  ;;  %p1163_p10 = por %p1162_p7, %p1161_p3 }
  0x4d   : > { %p1164_p8 = pnand %p1163_p10, %p1157_p13 }
  0x4f   : > { %1167 = shalt.err (!%p1164_p8)
}
  0x50   : > { %1049 = dma.hbm_to_vmem [thread:$0]  (!%p1442_p11), %s1440_s16, 128, %s1446_s12, %s359_s14  }
  0x51   : > { %p1666_p5 = scmp.ne.s32.totalorder %s1659_s26, 0 }
  0x52   : > { %s1476_s15 = sand.u32 (!%p1666_p5), 1, %s1262_s20   ;;  %p1667_p0 = scmp.ne.s32.totalorder (!%p1666_p5), %s1656_s24, 0 }
  0x53   : > { %378 = sbr.rel (%p1666_p5) target bundleno = 1246 (0x4de), region = 56  ;;  %s1479_s17 = sshll.u32 (!%p1666_p5), %s1476_s15, 3 }
  0x54   : > { %s381_s27 = scalar_lea.sflag (!%p1666_p5), [#allocation6], %s1476_s15  ;;  %s384_s29 = scalar_lea.vmem (!%p1666_p5), [#allocation5], %s1479_s17 }
  0x5a   : > { %1241 = dma.done.wait (%p1667_p0), %s381_s27, 128  }
  0x5b   : > { %1243 = vsyncadd (%p1667_p0), %s381_s27, 4294967168  ;;  %p1668_p11 = scmp.eq.s32.totalorder %s1368_s8, 0 }
  0x5d   : > { %1245 = dma.done.wait (%p1668_p11), [#allocation9], 1024   ;;  %p1669_p2 = pmov %p1668_p11 }
  0x5e   : > { %p436_p1 = scmp.lt.s32.totalorder %s1368_s8, 7  ;;  %s1650_s23 = scalar_lea.vmem [#allocation11], %s1479_s17 }
  0x5f   : > { %1247 = vsyncadd (%p1669_p2), [#allocation9], 4294966272  ;;  %p1670_p4 = scmp.ne.s32.totalorder %s1368_s8, 0 }
  0x60   : > { %s437_s26 = scalar_select %p436_p1, %s1368_s8, 7 }
  0x61   : > { %443 = sbr.rel (%p1670_p4) target bundleno = 106 (0x6a), region = 68  ;;  %s1671_s1 = sld [smem:[#allocation21_spill]] (!%p1670_p4)  ;;  %vm445_vm0 = vcmask (!%p1670_p4), 261120  }
  0x62   : > { %s942_s16 = sshll.u32 %s437_s26, 3  ;;  %s1672_s2 = sld [smem:[#allocation22_spill]] (!%p1670_p4) }
  0x63   : > { %s1496_s14 = scalar_lea.vmem %s1640_s9, %s942_s16 }
  0x67   : > { %v444_v1 = vld [vmem:[%s1671_s1] sm:$0xff] (!%p1670_p4) }
  0x68   : > { %v447_v2 = vld [vmem:[%s1672_s2] sm:$0xff]  ;;  %446 = vst.msk [vmem:[#allocation2] sm:$0xff] %vm445_vm0, %v444_v1 }
  0x69   : > { %448 = vst.msk [vmem:[#allocation3] sm:$0xff] %vm445_vm0, %v447_v2 }
  0x6a PF: > { %v452_v3 = vld [vmem:[%s1634_s3] sm:$0xff]  ;;  %v453_v4 = vld [vmem:[%s1634_s3 + $0x8] sm:$0xff]  ;;  %v1276_v5 = vmov 0.0|0.0   ;;  %vm1277_vm1 = vmmov 0   ;;  %v1278_v7 = vmov 0.0   ;;  %s1279_s28 = smov 32  }
  0x6b   : > { %1011 = vmatprep.subr.bf16.mxu0 %v1276_v5  ;;  %v1012_v6 = vpack.c.bf16 %v453_v4, %v452_v3  ;;  %978 = vmatprep.mubr.msk.f32.mxu0 %vm1277_vm1, %v1278_v7  ;;  %v542_v9 = vld [vmem:[#allocation8] sm:$0xff]  ;;  %v543_v10 = vld [vmem:[#allocation8 + $0x8] sm:$0xff]  ;;  %v544_v12 = vld [vmem:[#allocation8 + $0x10] sm:$0xff]  ;;  %vm461_vm2 = vcmask 130048   ;;  %vm540_vm3 = vcmask 261120   ;;  %vm557_vm4 = vcmask 523264  }
  0x6c   : > { %1014 = vmatprep.subr.bf16.mxu1 %v1276_v5  ;;  %v1015_v11 = vpack.c.bf16 %v543_v10, %v542_v9  ;;  %v545_v13 = vld [vmem:[#allocation8 + $0x18] sm:$0xff]  ;;  %997 = vmatprep.mubr.msk.f32.mxu1 %vm1277_vm1, %v1278_v7  ;;  %v546_v16 = vld [vmem:[#allocation8 + $0x20] sm:$0xff]  ;;  %v547_v17 = vld [vmem:[#allocation8 + $0x28] sm:$0xff]  ;;  %s1280_s26 = smov 64   ;;  %s1281_s16 = smov 96  }
  0x6d   : > { %1013 = vmatpush3.bf16.msra.mxu0 %v1012_v6  ;;  %v449_v14 = vld [vmem:[%s384_s29] sm:$0xff]  ;;  %v1018_v15 = vpack.c.bf16 %v545_v13, %v544_v12  ;;  %v1021_v18 = vpack.c.bf16 %v547_v17, %v546_v16  ;;  %v660_v46 = vld [vmem:[%s1638_s7 + $0x8] sm:$0xff]  ;;  %s1673_s24 = scalar_lea.vmem [#allocation10], %s1479_s17  ;;  %s761_s30 = scalar_lea.sflag [#allocation7], %s1476_s15 }
  0x6e   : > { %1016 = vmatpush3.bf16.msra.mxu1 %v1015_v11  ;;  %1026 = vmatprep.subr.bf16.mxu0 %v1276_v5  ;;  %v548_v19 = vld [vmem:[#allocation8 + $0x30] sm:$0xff]  ;;  %v549_v20 = vld [vmem:[#allocation8 + $0x38] sm:$0xff]  ;;  %s1674_s12 = smov %s1673_s24 }
  0x6f   : > { %1017 = vmatprep.subr.bf16.mxu1 %v1276_v5  ;;  %v1024_v21 = vpack.c.bf16 %v549_v20, %v548_v19  ;;  %v944_v23 = vld [vmem:[%s1635_s4] ss:$0 sm:$0xff]  ;;  %v661_v47 = vld [vmem:[%s1638_s7 + $0x10] sm:$0xff]  ;;  %v662_v49 = vld [vmem:[%s1638_s7 + $0x18] sm:$0xff]  ;;  %s782_s13 = sshll.u32 %s1674_s12, 4  ;;  %s783_s13 = int_to_ptr.vmem [resolvable:$true] %s782_s13 }
  0x70   : > { %979 = vmatmul.mubr.msk.f32.vlgmr.msra.gmra.mrb[0].mxu0 %vm461_vm2, %v449_v14  ;;  %v451_v22 = vld [vmem:[#allocation3] sm:$0xff]  ;;  %v946_v30 = vld [vmem:[%s1637_s6] ss:$0 sm:$0xff]  ;;  %v1030_v50 = vpack.c.bf16 %v662_v49, %v661_v47  ;;  %s1168_s27 = scalar_lea.vmem %s783_s13, 128 }
  0x71   : > { %v450_v8 = vld [vmem:[#allocation2] sm:$0xff]  ;;  %1008 = vmatprep.mubr.msk.f32.mxu0 %vm1277_vm1, %v1278_v7  ;;  %639 = vrot.lane.b32.xlu1 %v451_v22, %s1279_s28  ;;  %p1169_p6 = scmp.ne.s32.totalorder %s783_s13, %s1168_s27 }
  0x72   : > { %537 = vrot.lane.b32.xlu0 %v450_v8, %s1279_s28  ;;  %1019 = vmatpush3.bf16.msra.mxu1 %v1018_v15  ;;  %v659_v45 = vld [vmem:[%s1638_s7] sm:$0xff] }
  0x73   : > { %1020 = vmatprep.subr.bf16.mxu1 %v1276_v5  ;;  %v1027_v48 = vpack.c.bf16 %v660_v46, %v659_v45  ;;  %p1170_p9 = pnand %p1169_p6, %p1431_p12 }
  0x75   : > { %1028 = vmatpush3.bf16.msra.mxu0 %v1027_v48  ;;  %p1171_p13 = pneg %p1170_p9 }
  0x76   : > { %1022 = vmatpush3.bf16.msra.mxu1 %v1021_v18  ;;  %1029 = vmatprep.subr.bf16.mxu0 %v1276_v5 }
  0x77   : > { %1023 = vmatprep.subr.bf16.mxu1 %v1276_v5 }
  0x79   : > { %1031 = vmatpush3.bf16.msra.mxu0 %v1030_v50 }
  0x7a   : > { %1025 = vmatpush3.bf16.msra.mxu1 %v1024_v21 }
  0xe3   : > { %v640_v41 = vpop.permute.xlu1 %639 }
  0xe4   : > { %v538_v27 = vpop.permute.xlu0 %537 }
 0x143   : > { %v531_v24 = vpop.f32.mrb[0].mxu0 }
 0x144   : > { %v532_v25 = vadd.f32 %v944_v23, %v531_v24  ;;  %v980_v26 = vpop.f32.mrb[1].mxu0 }
 0x146   : > { %v535_v28 = vmax.f32 %v532_v25, 0.0 }
 0x148   : > { %v541_v29 = vsel %vm540_vm3, %v535_v28, %v538_v27 }
 0x149   : > { %998 = vmatmul.mubr.msk.f32.vlgmr.msra.gmra.mrb[0].mxu1 %vm557_vm4, %v541_v29 }
 0x21c   : > { %v627_v31 = vpop.f32.mrb[0].mxu1 }
 0x21d   : > { %v628_v32 = vadd.f32 %v946_v30, %v627_v31  ;;  %v999_v33 = vpop.f32.mrb[1].mxu1 }
 0x21f   : > { %1102 = vtanh.f32 %v628_v32  ;;  %v948_v35 = vmul.f32 -1.442695, %v628_v32 }
 0x221   : > { %1104 = vpow2.f32 %v948_v35 }
 0x229   : > { %v1103_v34 = vpop.eup %1102 }
 0x22a   : > { %644 = vrot.lane.b32.xlu0 %v1103_v34, %s1280_s26 }
 0x22b   : > { %v1105_v36 = vpop.eup %1104 }
 0x22c   : > { %v634_v37 = vadd.f32 1.0, %v1105_v36 }
 0x22e   : > { %1106 = vrcp.f32 %v634_v37 }
 0x238   : > { %v1107_v38 = vpop.eup %1106 }
 0x239   : > { %v642_v42 = vmul.f32 %v1107_v38, %v640_v41 }
 0x29c   : > { %v645_v39 = vpop.permute.xlu0 %644 }
 0x29d   : > { %v647_v40 = vmul.f32 %v1107_v38, %v645_v39 }
 0x29f   : > { %649 = vrot.lane.b32.xlu1 %v647_v40, %s1279_s28 }
 0x311   : > { %v650_v43 = vpop.permute.xlu1 %649 }
 0x312   : > { %v652_v44 = vadd.f32 %v650_v43, %v642_v42 }
 0x314   : > { %1108 = vtanh.f32 %v652_v44 }
 0x31e   : > { %v1109_v51 = vpop.eup %1108 }
 0x31f   : > { %655 = vrot.lane.b32.xlu0 %v1109_v51, %s1280_s26  ;;  %s1651_s26 = sshll.u32 %s1368_s8, 7 }
 0x320   : > { %s1566_s19 = scalar_lea.hbm %s1641_s10, %s1651_s26 }
 0x323   : > { %750 = vrot.lane.b32.xlu0 %v652_v44, %s1281_s16  ;;  %s1282_s16 = smov [#allocation10]  }
 0x391   : > { %v656_v52 = vpop.permute.xlu0 %655 }
 0x392   : > { %v658_v53 = vmul.f32 %v1107_v38, %v656_v52 }
 0x394   : > { %671 = vrot.lane.b32.xlu1 %v658_v53, %s1279_s28 }
 0x395   : > { %v751_v54 = vpop.permute.xlu0 %750 }
 0x396   : > { %753 = vst.msk [vmem:[%s1650_s23] sm:$0xff] %vm540_vm3, %v751_v54  ;;  %755 = vst.msk [vmem:[#allocation3] sm:$0xff] %vm540_vm3, %v751_v54 }
 0x406   : > { %v672_v55 = vpop.permute.xlu1 %671 }
 0x407   : > { %748 = vst.msk [vmem:[%s1673_s24] sm:$0xff] %vm540_vm3, %v672_v55  ;;  %754 = vst.msk [vmem:[#allocation2] sm:$0xff] %vm540_vm3, %v672_v55  ;;  %1009 = vmatmul.mubr.msk.f32.vlgmr.msra.gmra.mrb[2].mxu0 %vm540_vm3, %v672_v55  ;;  %s1172_s24 = sshll.u32 %s1282_s16, 4  ;;  %s1173_s24 = int_to_ptr.vmem [resolvable:$false] %s1172_s24 }
 0x408   : > { %s1174_s23 = scalar_lea.vmem %s1173_s24, 256  ;;  %p1175_p3 = scmp.lt.s32.totalorder %s783_s13, %s1173_s24 }
 0x409   : > { %p1176_p7 = scmp.lt.s32.totalorder %s1174_s23, %s1168_s27 }
 0x40b   : > { %p1177_p10 = por %p1176_p7, %p1175_p3 }
 0x40d   : > { %p1178_p8 = pnand %p1177_p10, %p1171_p13 }
 0x40f   : > { %1181 = shalt.err (!%p1178_p8)
}
 0x410   : > { %s1182_s12 = scalar_lea.hbm %s1566_s19, 128  ;;  %s1186_s16 = scalar_lea.hbm %s1641_s10, 1024 }
 0x411   : > { %p1183_p5 = scmp.ne.s32.totalorder %s1566_s19, %s1182_s12  ;;  %p1187_p2 = scmp.lt.u32.totalorder %s1566_s19, %s1641_s10 }
 0x412   : > { %p1188_p1 = scmp.lt.u32.totalorder %s1186_s16, %s1182_s12  ;;  %p1190_p6 = scmp.lt.u32.totalorder %s1182_s12, %s1566_s19 }
 0x413   : > { %p1184_p0 = pnand %p1183_p5, %p1431_p12 }
 0x414   : > { %p1189_p4 = por %p1188_p1, %p1187_p2 }
 0x415   : > { %p1185_p11 = pneg %p1184_p0 }
 0x416   : > { %p1191_p9 = por %p1190_p6, %p1189_p4 }
 0x418   : > { %p1192_p13 = pnand %p1191_p9, %p1185_p11 }
 0x41a   : > { %1195 = shalt.err (!%p1192_p13)
}
 0x41b   : > { %1038 = dma.vmem_to_hbm [thread:$0]  (%p1431_p12), %s783_s13, 128, %s1566_s19, %s761_s30  }
 0x41c   : > { %s1675_s23 = sshll.u32 %s1368_s8, 7  ;;  %s1676_s28 = scalar_lea.vmem [#allocation11], %s1479_s17 }
 0x41d   : > { %s1591_s26 = scalar_lea.hbm %s1642_s11, %s1675_s23  ;;  %s795_s16 = sshll.u32 %s1676_s28, 4  ;;  %s796_s16 = int_to_ptr.vmem [resolvable:$true] %s795_s16 }
 0x41e   : > { %s766_s12 = scalar_lea.sflag [#allocation12], %s1476_s15  ;;  %s1196_s24 = scalar_lea.vmem %s796_s16, 128 }
 0x41f   : > { %p1197_p3 = scmp.ne.s32.totalorder %s796_s16, %s1196_s24  ;;  %s1283_s0 = smov [#allocation11]  }
 0x420   : > { %s1200_s1 = sshll.u32 %s1283_s0, 4  ;;  %s1201_s1 = int_to_ptr.vmem [resolvable:$false] %s1200_s1 }
 0x421   : > { %p1198_p7 = pnand %p1197_p3, %p1431_p12  ;;  %s1202_s2 = scalar_lea.vmem %s1201_s1, 256 }
 0x422   : > { %p1203_p8 = scmp.lt.s32.totalorder %s796_s16, %s1201_s1  ;;  %p1204_p5 = scmp.lt.s32.totalorder %s1202_s2, %s1196_s24 }
 0x423   : > { %p1199_p10 = pneg %p1198_p7 }
 0x424   : > { %p1205_p0 = por %p1204_p5, %p1203_p8 }
 0x426   : > { %p1206_p11 = pnand %p1205_p0, %p1199_p10 }
 0x428   : > { %1209 = shalt.err (!%p1206_p11)
}
 0x429   : > { %s1210_s8 = scalar_lea.hbm %s1591_s26, 128  ;;  %s1214_s0 = scalar_lea.hbm %s1642_s11, 1024 }
 0x42a   : > { %p1211_p2 = scmp.ne.s32.totalorder %s1591_s26, %s1210_s8  ;;  %p1215_p6 = scmp.lt.u32.totalorder %s1591_s26, %s1642_s11 }
 0x42b   : > { %p1216_p9 = scmp.lt.u32.totalorder %s1214_s0, %s1210_s8  ;;  %p1218_p3 = scmp.lt.u32.totalorder %s1210_s8, %s1591_s26 }
 0x42c   : > { %p1212_p1 = pnand %p1211_p2, %p1431_p12 }
 0x42d   : > { %p1217_p13 = por %p1216_p9, %p1215_p6 }
 0x42e   : > { %p1213_p4 = pneg %p1212_p1 }
 0x42f   : > { %p1219_p7 = por %p1218_p3, %p1217_p13 }
 0x431   : > { %p1220_p10 = pnand %p1219_p7, %p1213_p4 }
 0x433   : > { %1223 = shalt.err (!%p1220_p10)
}
 0x434   : > { %1039 = dma.vmem_to_hbm [thread:$0]  (%p1431_p12), %s796_s16, 128, %s1591_s26, %s766_s12   ;;  %v949_v56 = vld [vmem:[#allocation4] ss:$0 sm:$0xff]  ;;  %vm745_vm5 = vcmask 7168  }
 0x4da   : > { %v741_v57 = vpop.f32.mrb[2].mxu0 }
 0x4db   : > { %v742_v58 = vadd.f32 %v949_v56, %v741_v57  ;;  %v1010_v59 = vpop.f32.mrb[3].mxu0 }
 0x4dd   : > { %746 = vst.msk [vmem:[%s1496_s14] sm:$0xff] %vm745_vm5, %v742_v58 }
 0x4de PF: > { %s1677_s2 = sld [smem:[#allocation17_spill]]  ;;  %s1678_s19 = sld [smem:[#allocation18_spill]] }
 0x4df   : > { %p1060_p8 = scmp.ge.s32.totalorder %s1270_s22, 2 }
 0x4e4   : > { %s814_s30 = sand.u32 1, %s1677_s2   ;;  %p1679_p5 = scmp.ne.s32.totalorder %s1678_s19, 0 }
 0x4e5   : > { %s815_s23 = scalar_lea.sflag [#allocation7], %s814_s30 }
 0x4e6   : > { %p1051_p0 = pnand %p1060_p8, %p1679_p5 }
 0x4e8   : > { %1249 = dma.done.wait (!%p1051_p0), %s815_s23, 128  }
 0x4e9   : > { %1251 = vsyncadd (!%p1051_p0), %s815_s23, 4294967168  ;;  %s824_s18 = scalar_lea.sflag [#allocation12], %s814_s30 }
 0x4ea   : > { %1253 = dma.done.wait (!%p1051_p0), %s824_s18, 128  }
 0x4eb   : > { %1255 = vsyncadd (!%p1051_p0), %s824_s18, 4294967168  ;;  %s1680_s22 = sld [smem:[#allocation19_spill]]  ;;  %s1681_s19 = smov %s1262_s20 }
 0x4ec   : > { %s1682_s20 = smov %s1266_s21  ;;  %s1683_s21 = smov %s1427_s25 }
 0x4f1   : > { %p31_p12 = scmp.ge.s32.totalorder %s1680_s22, 10  }
 0x4f3   :  { %33 = sbr.rel (!%p31_p12) target bundleno = 12 (0xc), region = 138 }
 0x4fa   :  { %829 = vsyncpa [#allocation6], 1 }
 0x4fb   :  { %831 = vsyncpa [#allocation6 + $0x1], 1 }
 0x4fc   :  { %832 = vsyncpa [#allocation9], 1 }
 0x4fd   :  { %833 = vsyncpa [#allocation7], 1 }
 0x4fe   :  { %835 = vsyncpa [#allocation7 + $0x1], 1 }
 0x4ff   :  { %836 = vsyncpa [#allocation12], 1 }
 0x500   :  { %838 = vsyncpa [#allocation12 + $0x1], 1 }

</bundles_post_ra>
